<compile_context>
chip_gen: v5e
topology: v5e:2x2
jax: 0.10.0
libtpu: 0.0.40
codegen_flags: <defaults>
</compile_context>

<pallas_src>
import functools

import jax
import jax.numpy as jnp
from jax import lax
from jax.experimental import pallas as pl
from jax.experimental.pallas import tpu as pltpu


def _round_up(x, m):
    return ((x + m - 1) // m) * m


def _bigram_kernel(idx_ref, tgt_ref, table_ref, logits_ref, loss_ref, acc_ref,
                   *, n_tokens, lse_col):
    # idx_ref, tgt_ref : (tile_n, 1) int32
    # table_ref        : (v_pad, v_pad) f32, resident (column `lse_col` = row logsumexp)
    # logits_ref       : (tile_n, v_pad) f32 out (lane-dense)
    # loss_ref         : (1, 1) f32 out (resident accumulator target)
    # acc_ref          : (1, 1) f32 VMEM scratch (running CE sum)
    tile_n, v_pad = logits_ref.shape
    i = pl.program_id(0)

    @pl.when(i == 0)
    def _init():
        acc_ref[...] = jnp.zeros_like(acc_ref)

    lane = lax.broadcasted_iota(jnp.int32, (tile_n, v_pad), 1)

    # Embedding lookup as one-hot @ padded table: exact gather, MXU 128-aligned.
    one_hot = (lane == idx_ref[...]).astype(jnp.float32)
    logits = jnp.dot(one_hot, table_ref[...], preferred_element_type=jnp.float32)
    logits_ref[...] = logits  # unmasked lane-dense (tile_n, 128) store

    # Per-token CE contribution: lse (gathered from the stashed column, same
    # matmul result) minus the target logit — a single lane reduction per token.
    pick = ((lane == lse_col).astype(jnp.float32)
            - (lane == tgt_ref[...]).astype(jnp.float32))
    contrib = jnp.sum(logits * pick, axis=-1, keepdims=True)        # (tile_n, 1)

    # Mask tokens that only exist because N was padded up to the tile size.
    row = lax.broadcasted_iota(jnp.int32, (tile_n, 1), 0) + i * tile_n
    contrib = jnp.where(row < n_tokens, contrib, 0.0)

    acc_ref[...] += jnp.sum(contrib, axis=0, keepdims=True)

    @pl.when(i == pl.num_programs(0) - 1)
    def _finalize():
        loss_ref[...] = acc_ref[...] * (1.0 / n_tokens)


def bigram_forward(input_idx, target, embedding_table, *, tile_n=1024):
    """Pallas equivalent of BigramModel.forward(input_idx, target)."""
    B, T = input_idx.shape
    V = embedding_table.shape[0]
    N = B * T

    # Pad vocab to a lane-dense / MXU-aligned width; reserve one extra column
    # (index V) for the per-row logsumexp so the loss shares the lookup matmul.
    v_pad = max(128, _round_up(V + 1, 128))

    table = embedding_table.astype(jnp.float32)
    row_max = jnp.max(table, axis=-1, keepdims=True)
    row_lse = (row_max
               + jnp.log(jnp.sum(jnp.exp(table - row_max), axis=-1, keepdims=True)))[:, 0]
    table_aug = jnp.zeros((v_pad, v_pad), jnp.float32)
    table_aug = table_aug.at[:V, :V].set(table)
    table_aug = table_aug.at[:V, V].set(row_lse)

    # Token tiling: stream (tile_n, v_pad) logit tiles; pad N up to the grid.
    tile_n = min(tile_n, _round_up(N, 8))
    n_pad = _round_up(N, tile_n)
    grid = (n_pad // tile_n,)

    idx_flat = jnp.zeros((n_pad, 1), jnp.int32).at[:N, 0].set(
        input_idx.reshape(N).astype(jnp.int32))
    if target is None:
        tgt_flat = jnp.zeros((n_pad, 1), jnp.int32)
    else:
        tgt_flat = jnp.zeros((n_pad, 1), jnp.int32).at[:N, 0].set(
            target.reshape(N).astype(jnp.int32))

    kernel = functools.partial(_bigram_kernel, n_tokens=N, lse_col=V)

    logits_pad, loss = pl.pallas_call(
        kernel,
        grid=grid,
        out_shape=(
            jax.ShapeDtypeStruct((n_pad, v_pad), jnp.float32),
            jax.ShapeDtypeStruct((1, 1), jnp.float32),
        ),
        in_specs=[
            pl.BlockSpec((tile_n, 1), lambda i: (i, 0)),
            pl.BlockSpec((tile_n, 1), lambda i: (i, 0)),
            pl.BlockSpec((v_pad, v_pad), lambda i: (0, 0)),   # table stays resident
        ],
        out_specs=(
            pl.BlockSpec((tile_n, v_pad), lambda i: (i, 0)),  # streamed, lane-dense
            pl.BlockSpec((1, 1), lambda i: (0, 0)),           # resident loss
        ),
        scratch_shapes=[pltpu.VMEM((1, 1), jnp.float32)],
        compiler_params=pltpu.CompilerParams(
            dimension_semantics=("arbitrary",),  # loss accumulates across this axis
            vmem_limit_bytes=32 * 1024 * 1024,
        ),
    )(idx_flat, tgt_flat, table_aug)

    logits = logits_pad[:N, :V].reshape(B, T, V)
    if target is None:
        return logits, None
    return logits, loss[0, 0]


def _reference_forward(input_idx, target, table):
    # Pure-JAX reference mirroring PyTorch: embedding lookup + cross_entropy (mean).
    logits = table[input_idx]                                   # (B, T, V)
    B, T, V = logits.shape
    flat = logits.reshape(B * T, V)
    tgt = target.reshape(B * T)
    logprobs = jax.nn.log_softmax(flat, axis=-1)
    loss = -jnp.mean(logprobs[jnp.arange(B * T), tgt])
    return logits, loss


if __name__ == "__main__":
    key = jax.random.PRNGKey(0)
    k_tab, k_idx, k_tgt = jax.random.split(key, 3)

    vocab_size = 32   # synthetic vocab (set of distinct chars in input.txt)
    B, T = 2, 8

    # nn.Embedding default init is N(0, 1).
    embedding_table = jax.random.normal(k_tab, (vocab_size, vocab_size), dtype=jnp.float32)
    input_idx = jax.random.randint(k_idx, (B, T), 0, vocab_size, dtype=jnp.int32)
    target = jax.random.randint(k_tgt, (B, T), 0, vocab_size, dtype=jnp.int32)

    logits, loss = bigram_forward(input_idx, target, embedding_table)
    jax.block_until_ready((logits, loss))

    ref_logits, ref_loss = _reference_forward(input_idx, target, embedding_table)
    assert jnp.allclose(logits, ref_logits, atol=1e-5), "logits mismatch"
    assert jnp.allclose(loss, ref_loss, atol=1e-5), "loss mismatch"

    # TODO(synk): generate() uses a host-side torch.multinomial sampling loop; sampling
    # control flow is not implemented in the kernel.
    print("KERNEL_OK")
</pallas_src>

<mosaic_0001>
module attributes {stable_mosaic.version = 11 : i64} {
  func.func @_bigram_kernel(%arg0: i32, %arg1: memref<16x1xi32, #tpu.memory_space<vmem>>, %arg2: memref<16x1xi32, #tpu.memory_space<vmem>>, %arg3: memref<128x128xf32, #tpu.memory_space<vmem>>, %arg4: memref<16x128xf32, #tpu.memory_space<vmem>>, %arg5: memref<1x1xf32, #tpu.memory_space<vmem>>, %arg6: memref<1x1xf32, #tpu.memory_space<vmem>>) attributes {dimension_semantics = [#tpu.dimension_semantics<arbitrary>], iteration_bounds = array<i64: 1>, scalar_prefetch = 0 : i64, scratch_operands = 1 : i64, tpu.core_type = #tpu.core_type<tc>, window_params = [{transform_indices = @transform_0, window_bounds = array<i64: 16, 1>}, {transform_indices = @transform_1, window_bounds = array<i64: 16, 1>}, {pipeline_mode = #tpu.pipeline_mode<synchronous>, transform_indices = @transform_2, window_bounds = array<i64: 128, 128>}, {transform_indices = @transform_3, window_bounds = array<i64: 16, 128>}, {pipeline_mode = #tpu.pipeline_mode<synchronous>, transform_indices = @transform_4, window_bounds = array<i64: 1, 1>}]} {
    %c0_i32 = arith.constant 0 : i32
    %0 = arith.cmpi eq, %arg0, %c0_i32 : i32
    %1 = arith.extui %0 : i1 to i32
    %c0_i32_0 = arith.constant 0 : i32
    %2 = arith.cmpi ne, %1, %c0_i32_0 : i32
    scf.if %2 {
      %cst_18 = arith.constant 0.000000e+00 : f32
      %41 = vector.broadcast %cst_18 : f32 to vector<1x1xf32>
      %c0_19 = arith.constant 0 : index
      %c0_20 = arith.constant 0 : index
      %42 = vector.load %arg6[%c0_19, %c0_20] : memref<1x1xf32, #tpu.memory_space<vmem>>, vector<1x1xf32>
      tpu.vector_store %arg6[%c0_19, %c0_20], %41 {strides = array<i32>} : memref<1x1xf32, #tpu.memory_space<vmem>>, vector<1x1xf32>,
    } else {
    }
    %3 = tpu.iota {dimensions = array<i32: 1>} : vector<16x128xi32>
    %c0 = arith.constant 0 : index
    %c0_1 = arith.constant 0 : index
    %4 = vector.load %arg1[%c0, %c0_1] : memref<16x1xi32, #tpu.memory_space<vmem>>, vector<16x1xi32>
    %5 = vector.broadcast %4 : vector<16x1xi32> to vector<16x128xi32>
    %6 = arith.cmpi eq, %3, %5 : vector<16x128xi32>
    %7 = arith.extui %6 : vector<16x128xi1> to vector<16x128xi32>
    %8 = arith.sitofp %7 : vector<16x128xi32> to vector<16x128xf32>
    %c0_2 = arith.constant 0 : index
    %c0_3 = arith.constant 0 : index
    %9 = vector.load %arg3[%c0_2, %c0_3] : memref<128x128xf32, #tpu.memory_space<vmem>>, vector<128x128xf32>
    %cst = arith.constant dense<0.000000e+00> : vector<16x128xf32>
    %10 = tpu.matmul %8, %9, %cst {dimension_numbers = #tpu.dot_dimension_numbers<[1], [0], [0], [1], [0, 0, 1, 1], [], []>} : vector<16x128xf32>, vector<128x128xf32>, vector<16x128xf32> -> vector<16x128xf32>
    %c0_4 = arith.constant 0 : index
    %c0_5 = arith.constant 0 : index
    %11 = vector.load %arg4[%c0_4, %c0_5] : memref<16x128xf32, #tpu.memory_space<vmem>>, vector<16x128xf32>
    tpu.vector_store %arg4[%c0_4, %c0_5], %10 {strides = array<i32>} : memref<16x128xf32, #tpu.memory_space<vmem>>, vector<16x128xf32>,
    %c32_i32 = arith.constant 32 : i32
    %12 = vector.broadcast %c32_i32 : i32 to vector<16x128xi32>
    %13 = arith.cmpi eq, %3, %12 : vector<16x128xi32>
    %14 = arith.extui %13 : vector<16x128xi1> to vector<16x128xi32>
    %15 = arith.sitofp %14 : vector<16x128xi32> to vector<16x128xf32>
    %c0_6 = arith.constant 0 : index
    %c0_7 = arith.constant 0 : index
    %16 = vector.load %arg2[%c0_6, %c0_7] : memref<16x1xi32, #tpu.memory_space<vmem>>, vector<16x1xi32>
    %17 = vector.broadcast %16 : vector<16x1xi32> to vector<16x128xi32>
    %18 = arith.cmpi eq, %3, %17 : vector<16x128xi32>
    %19 = arith.extui %18 : vector<16x128xi1> to vector<16x128xi32>
    %20 = arith.sitofp %19 : vector<16x128xi32> to vector<16x128xf32>
    %21 = arith.subf %15, %20 : vector<16x128xf32>
    %22 = arith.mulf %10, %21 : vector<16x128xf32>
    %cst_8 = arith.constant dense<0.000000e+00> : vector<16xf32>
    %23 = vector.multi_reduction <add>, %22, %cst_8 [1] : vector<16x128xf32> to vector<16xf32>
    %24 = vector.shape_cast %23 : vector<16xf32> to vector<16x1xf32>
    %25 = tpu.iota {dimensions = array<i32: 0>} : vector<16x1xi32>
    %c16_i32 = arith.constant 16 : i32
    %26 = arith.muli %arg0, %c16_i32 : i32
    %27 = vector.broadcast %26 : i32 to vector<16x1xi32>
    %28 = arith.addi %25, %27 : vector<16x1xi32>
    %c16_i32_9 = arith.constant 16 : i32
    %29 = vector.broadcast %c16_i32_9 : i32 to vector<16x1xi32>
    %30 = arith.cmpi slt, %28, %29 : vector<16x1xi32>
    %cst_10 = arith.constant 0.000000e+00 : f32
    %31 = vector.broadcast %cst_10 : f32 to vector<16x1xf32>
    %32 = arith.select %30, %24, %31 : vector<16x1xi1>, vector<16x1xf32>
    %c0_11 = arith.constant 0 : index
    %c0_12 = arith.constant 0 : index
    %33 = vector.load %arg6[%c0_11, %c0_12] : memref<1x1xf32, #tpu.memory_space<vmem>>, vector<1x1xf32>
    %cst_13 = arith.constant dense<0.000000e+00> : vector<1xf32>
    %34 = vector.multi_reduction <add>, %32, %cst_13 [0] : vector<16x1xf32> to vector<1xf32>
    %35 = vector.shape_cast %34 : vector<1xf32> to vector<1x1xf32>
    %36 = arith.addf %33, %35 : vector<1x1xf32>
    %c0_14 = arith.constant 0 : index
    %c0_15 = arith.constant 0 : index
    %37 = vector.load %arg6[%c0_14, %c0_15] : memref<1x1xf32, #tpu.memory_space<vmem>>, vector<1x1xf32>
    tpu.vector_store %arg6[%c0_14, %c0_15], %36 {strides = array<i32>} : memref<1x1xf32, #tpu.memory_space<vmem>>, vector<1x1xf32>,
    %c0_i32_16 = arith.constant 0 : i32
    %38 = arith.cmpi eq, %arg0, %c0_i32_16 : i32
    %39 = arith.extui %38 : i1 to i32
    %c0_i32_17 = arith.constant 0 : i32
    %40 = arith.cmpi ne, %39, %c0_i32_17 : i32
    scf.if %40 {
      %c0_18 = arith.constant 0 : index
      %c0_19 = arith.constant 0 : index
      %41 = vector.load %arg6[%c0_18, %c0_19] : memref<1x1xf32, #tpu.memory_space<vmem>>, vector<1x1xf32>
      %cst_20 = arith.constant 6.250000e-02 : f32
      %42 = vector.broadcast %cst_20 : f32 to vector<1x1xf32>
      %43 = arith.mulf %41, %42 : vector<1x1xf32>
      %c0_21 = arith.constant 0 : index
      %c0_22 = arith.constant 0 : index
      %44 = vector.load %arg5[%c0_21, %c0_22] : memref<1x1xf32, #tpu.memory_space<vmem>>, vector<1x1xf32>
      tpu.vector_store %arg5[%c0_21, %c0_22], %43 {strides = array<i32>} : memref<1x1xf32, #tpu.memory_space<vmem>>, vector<1x1xf32>,
    } else {
    }
    return
  }
  func.func @transform_0(%arg0: i32) -> (i32, i32) {
    %c0_i32 = arith.constant 0 : i32
    %c0_i32_0 = arith.constant 0 : i32
    return %arg0, %c0_i32 : i32, i32
  }
  func.func @transform_1(%arg0: i32) -> (i32, i32) {
    %c0_i32 = arith.constant 0 : i32
    %c0_i32_0 = arith.constant 0 : i32
    return %arg0, %c0_i32 : i32, i32
  }
  func.func @transform_2(%arg0: i32) -> (i32, i32) {
    %c0_i32 = arith.constant 0 : i32
    %c0_i32_0 = arith.constant 0 : i32
    %c0_i32_1 = arith.constant 0 : i32
    return %c0_i32, %c0_i32_0 : i32, i32
  }
  func.func @transform_3(%arg0: i32) -> (i32, i32) {
    %c0_i32 = arith.constant 0 : i32
    %c0_i32_0 = arith.constant 0 : i32
    return %arg0, %c0_i32 : i32, i32
  }
  func.func @transform_4(%arg0: i32) -> (i32, i32) {
    %c0_i32 = arith.constant 0 : i32
    %c0_i32_0 = arith.constant 0 : i32
    %c0_i32_1 = arith.constant 0 : i32
    return %c0_i32, %c0_i32_0 : i32, i32
  }
}

</mosaic_0001>

<bundles_post_ra>
// kernel: tpu_custom_call.1
= control target key start
LH: loop header
LB: loop body
LE: loop exit
PB: predicated region body
PF: predicated region fallthrough
CT: control target
= control target key end

     0   :  { %10 = vsyncpa [#allocation4], 0  ;;  %s359_s0 = inlined_call_operand.vmem [shape: s32[16,1], index: 0, kind: input, shape index: {}]   ;;  %s360_s1 = inlined_call_operand.vmem [shape: s32[16,1], index: 1, kind: input, shape index: {}]   ;;  %s361_s2 = inlined_call_operand.hbm [shape: f32[128,128], index: 2, kind: input, shape index: {}]   ;;  %s362_s3 = inlined_call_operand.hbm [shape: f32[16,128], index: 3, kind: output, shape index: {0}]   ;;  %s363_s4 = inlined_call_operand.hbm [shape: f32[1,1], index: 4, kind: output, shape index: {1}]  }
   0x1   :  { %11 = vsyncpa [#allocation5], 0 }
   0x2   :  { %12 = vsyncpa [#allocation8], 0  ;;  %s21_s17 = sshll.u32 %s361_s2, 4  ;;  %s296_s18 = smov [#allocation3]   ;;  %s22_s17 = int_to_ptr.hbm [resolvable:$true] %s21_s17 }
   0x3   :  { %s23_s19 = sshll.u32 %s296_s18, 4  ;;  %s297_s20 = smov 128   ;;  %s24_s19 = int_to_ptr.vmem [resolvable:$true] %s23_s19 }
   0x4   :  { %s298_s21 = smov 8  }
   0x5   :  { %29 = dma.hbm_to_vmem [thread:$0]  %s22_s17, 2048, %s24_s19, [#allocation4], %s297_s20, %s297_s20, %s298_s21  }
   0x6   :  { %290 = dma.done.wait [#allocation4], 2048  }
   0x7   :  { %291 = vsyncadd [#allocation4], 4294965248  ;;  %v299_v0 = vmov 0   ;;  %v42_v1 = vld [vmem:[%s359_s0] sm:$0xff]  ;;  %v70_v3 = vld [vmem:[#allocation3 + $0x70] sm:$0xff]  ;;  %v40_v21 = vlaneseq  ;;  %v300_v24 = vmov 1.0  }
   0x8   :  { %216 = vset.pattern.permute.xlu0 %v299_v0  ;;  %217 = vset.pattern.permute.xlu1 %v299_v0  ;;  %v71_v2 = vld [vmem:[#allocation3 + $0x78] sm:$0xff]  ;;  %v69_v4 = vld [vmem:[#allocation3 + $0x68] sm:$0xff]  ;;  %v68_v5 = vld [vmem:[#allocation3 + $0x60] sm:$0xff]  ;;  %v301_v27 = vmov 0.0   ;;  %s156_s29 = sshll.u32 %s362_s3, 4  ;;  %s302_s30 = smov [#allocation6]   ;;  %s157_s29 = int_to_ptr.hbm [resolvable:$true] %s156_s29 }
   0x9   :  { %45 = vperm.xlu0 %216, %v42_v1   ;;  %72 = vmatpush.msra.mxu0 %v71_v2  ;;  %v43_v6 = vld [vmem:[%s359_s0 + $0x8] sm:$0xff]  ;;  %v67_v7 = vld [vmem:[#allocation3 + $0x58] sm:$0xff]  ;;  %v66_v8 = vld [vmem:[#allocation3 + $0x50] sm:$0xff]  ;;  %v41_v22 = vand.u32 127, %v40_v21  ;;  %s154_s5 = sshll.u32 %s302_s30, 4  ;;  %vm38_vm5 = vcmask 0   ;;  %s155_s5 = int_to_ptr.vmem [resolvable:$true] %s154_s5 }
   0xa   :  { %192 = vmatpush.msra.mxu1 %v71_v2  ;;  %v65_v9 = vld [vmem:[#allocation3 + $0x48] sm:$0xff]  ;;  %v64_v10 = vld [vmem:[#allocation3 + $0x40] sm:$0xff]  ;;  %v63_v11 = vld [vmem:[#allocation3 + $0x38] sm:$0xff]  ;;  %39 = vst.msk [vmem:[#allocation2] sm:$0x1] %vm38_vm5, %v301_v27  ;;  %s303_s3 = smov [#allocation7]  }
   0xb   :  { %73 = vmatpush.msra.mxu0 %v70_v3  ;;  %v62_v12 = vld [vmem:[#allocation3 + $0x30] sm:$0xff]  ;;  %v61_v13 = vld [vmem:[#allocation3 + $0x28] sm:$0xff]  ;;  %v60_v14 = vld [vmem:[#allocation3 + $0x20] sm:$0xff]  ;;  %vm97_vm3 = vcmp.eq.s32.totalorder %v41_v22, 32  ;;  %s168_s6 = sshll.u32 %s303_s3, 4  ;;  %s170_s9 = sshll.u32 %s363_s4, 4  ;;  %s169_s6 = int_to_ptr.vmem [resolvable:$true] %s168_s6  ;;  %s171_s9 = int_to_ptr.hbm [resolvable:$true] %s170_s9 }
   0xc   :  { %193 = vmatpush.msra.mxu1 %v70_v3  ;;  %v59_v15 = vld [vmem:[#allocation3 + $0x18] sm:$0xff]  ;;  %v58_v16 = vld [vmem:[#allocation3 + $0x10] sm:$0xff]  ;;  %v57_v17 = vld [vmem:[#allocation3 + $0x8] sm:$0xff]  ;;  %v189_v29 = vsel %vm97_vm3, 1.0, %v301_v27 }
   0xd   :  { %74 = vmatpush.msra.mxu0 %v69_v4  ;;  %v100_v18 = vld [vmem:[%s360_s1] sm:$0xff]  ;;  %v101_v20 = vld [vmem:[%s360_s1 + $0x8] sm:$0xff] }
   0xe   :  { %194 = vmatpush.msra.mxu1 %v69_v4  ;;  %v56_v19 = vld [vmem:[#allocation3] sm:$0xff]  ;;  %103 = vperm.xlu1 %217, %v100_v18  }
   0xf   :  { %75 = vmatpush.msra.mxu0 %v68_v5 }
  0x10   :  { %195 = vmatpush.msra.mxu1 %v68_v5 }
  0x11   :  { %48 = vperm.xlu0 %216, %v43_v6   ;;  %76 = vmatpush.msra.mxu0 %v67_v7  ;;  %v133_v46 = vld [vmem:[#allocation2] sm:$0x1] }
  0x12   :  { %196 = vmatpush.msra.mxu1 %v67_v7 }
  0x13   :  { %77 = vmatpush.msra.mxu0 %v66_v8 }
  0x14   :  { %197 = vmatpush.msra.mxu1 %v66_v8 }
  0x15   :  { %78 = vmatpush.msra.mxu0 %v65_v9 }
  0x16   :  { %198 = vmatpush.msra.mxu1 %v65_v9  ;;  %106 = vperm.xlu1 %217, %v101_v20  }
  0x17   :  { %79 = vmatpush.msra.mxu0 %v64_v10 }
  0x18   :  { %199 = vmatpush.msra.mxu1 %v64_v10 }
  0x19   :  { %80 = vmatpush.msra.mxu0 %v63_v11 }
  0x1a   :  { %200 = vmatpush.msra.mxu1 %v63_v11 }
  0x1b   :  { %81 = vmatpush.msra.mxu0 %v62_v12 }
  0x1c   :  { %201 = vmatpush.msra.mxu1 %v62_v12 }
  0x1d   :  { %82 = vmatpush.msra.mxu0 %v61_v13 }
  0x1e   :  { %202 = vmatpush.msra.mxu1 %v61_v13 }
  0x1f   :  { %83 = vmatpush.msra.mxu0 %v60_v14 }
  0x20   :  { %203 = vmatpush.msra.mxu1 %v60_v14 }
  0x21   :  { %84 = vmatpush.msra.mxu0 %v59_v15 }
  0x22   :  { %204 = vmatpush.msra.mxu1 %v59_v15 }
  0x23   :  { %85 = vmatpush.msra.mxu0 %v58_v16 }
  0x24   :  { %205 = vmatpush.msra.mxu1 %v58_v16 }
  0x25   :  { %86 = vmatpush.msra.mxu0 %v57_v17 }
  0x26   :  { %206 = vmatpush.msra.mxu1 %v57_v17 }
  0x27   :  { %87 = vmatpush.msra.mxu0 %v56_v19 }
  0x28   :  { %207 = vmatpush.msra.mxu1 %v56_v19 }
  0x7b   :  { %v46_v23 = vpop.permute.xlu0 %45 }
  0x7c   :  { %vm50_vm0 = vcmp.eq.s32.totalorder %v41_v22, %v46_v23 }
  0x7d   :  { %187 = vmatmul.msk.f32.vlgmr.msra.gmra.mxu0 %vm50_vm0, %v300_v24 }
  0x80   :  { %v104_v26 = vpop.permute.xlu1 %103 }
  0x81   :  { %vm108_vm2 = vcmp.eq.s32.totalorder %v41_v22, %v104_v26 }
  0x82   :  { %v190_v28 = vsel %vm108_vm2, 1.0, %v301_v27 }
  0x83   :  { %v49_v25 = vpop.permute.xlu0 %48  ;;  %v114_v30 = vsub.f32 %v189_v29, %v190_v28 }
  0x84   :  { %vm51_vm1 = vcmp.eq.s32.totalorder %v41_v22, %v49_v25 }
  0x85   :  { %188 = vmatmul.msk.f32.vlgmr.msra.gmra.mxu1 %vm51_vm1, %v300_v24 }
  0x88   :  { %v107_v31 = vpop.permute.xlu1 %106 }
  0x89   :  { %vm109_vm4 = vcmp.eq.s32.totalorder %v41_v22, %v107_v31 }
  0x8a   :  { %v191_v34 = vsel %vm109_vm4, 1.0, %v301_v27 }
  0x8b   :  { %v115_v35 = vsub.f32 %v189_v29, %v191_v34 }
  0xfa   :  { %v89_v32 = vpop.f32.mrf.mxu0 }
  0xfb   :  { %95 = vst [vmem:[#allocation6] sm:$0xff] %v89_v32  ;;  %v116_v33 = vmul.f32 %v114_v30, %v89_v32 }
  0xfd   :  { %118 = vadd.xlane.f32.xlu2 %v116_v33 }
 0x102   :  { %v92_v36 = vpop.f32.mrf.mxu1 }
 0x103   :  { %96 = vst [vmem:[#allocation6 + $0x8] sm:$0xff] %v92_v36  ;;  %v117_v37 = vmul.f32 %v115_v35, %v92_v36 }
 0x104   :  { %162 = dma.vmem_to_hbm [thread:$0]  %s155_s5, 256, %s157_s29, [#allocation5], %s297_s20, %s297_s20, %s298_s21  }
 0x105   :  { %120 = vadd.xlane.f32.xlu2 %v117_v37 }
 0x170   :  { %v119_v38 = vpop.xlane.xlu2 %118 }
 0x178   :  { %v121_v39 = vpop.xlane.xlu2 %120 }
 0x179   :  { %v134_v40 = vadd.f32 %v121_v39, %v119_v38 }
 0x17b   :  { %v135_v41 = vrot.slane %v134_v40, 4 }
 0x17d   :  { %v136_v42 = vadd.f32 %v135_v41, %v134_v40 }
 0x17f   :  { %v137_v43 = vrot.slane %v136_v42, 2 }
 0x181   :  { %v138_v44 = vadd.f32 %v137_v43, %v136_v42 }
 0x183   :  { %v139_v45 = vrot.slane %v138_v44, 1 }
 0x185   :  { %v140_v47 = vadd.f32 %v139_v45, %v138_v44 }
 0x187   :  { %v141_v48 = vadd.f32 %v140_v47, %v133_v46 }
 0x189   :  { %143 = vst.msk [vmem:[#allocation2] sm:$0x1] %vm38_vm5, %v141_v48 }
 0x190   :  { %v147_v49 = vld [vmem:[#allocation2] sm:$0x1] }
 0x191   :  { %v148_v50 = vmul.f32 0.0625, %v147_v49 }
 0x193   :  { %149 = vst.msk [vmem:[#allocation7] sm:$0x1] %vm38_vm5, %v148_v50 }
 0x194   :  { %173 = dma.vmem_to_hbm [thread:$0]  %s169_s6, 16, %s171_s9, [#allocation8]  }
 0x195   :  { %292 = dma.done.wait [#allocation5], 256  }
 0x196   :  { %293 = vsyncadd [#allocation5], 4294967040 }
 0x197   :  { %294 = dma.done.wait [#allocation8], 16  }
 0x198   :  { %295 = vsyncadd [#allocation8], 4294967280 }
 0x199   :  { %182 = vsyncpa [#allocation4], 1 }
 0x19a   :  { %183 = vsyncpa [#allocation5], 1 }
 0x19b   :  { %184 = vsyncpa [#allocation8], 1 }

</bundles_post_ra>
